<compile_context>
chip_gen: v7x
topology: tpu7x:2x2x1
jax: 0.10.0
libtpu: 0.0.40
codegen_flags: <defaults>
</compile_context>

<pallas_src>
import math
from functools import partial

import jax
import jax.numpy as jnp
import numpy as np
from jax.experimental import pallas as pl
from jax.experimental.pallas import tpu as pltpu

# ---------------------------------------------------------------------------
# Model configuration (consistent with the PyTorch module):
#   in_channels     = embedding_dim + (raw_features - 1)
#   global_channels = in_channels          (layer 0 gets mean-pooled node feats)
#   out_channels    = hidden_channels      (required by W5's input dimension)
# ---------------------------------------------------------------------------
NUM_STATIONS = 535
EMB_DIM = 8
F_RAW = 5                       # column 0 = station id, 4 numeric features
IN_CH = EMB_DIM + (F_RAW - 1)   # 12
EDGE_CH = 3
GLOBAL_CH = IN_CH               # 12
HIDDEN_CH = 16
OUT_CH = 16
GLOBAL_OUT_CH = 10
NUM_LAYERS = 2

MXU_DTYPE = jnp.bfloat16        # MXU inputs; accumulation is always f32
N_W_PER_LAYER = 9               # W1t W2t W3t W4xit W4xjt W4et W4gt W5gt W5pt
N_B_PER_LAYER = 3               # b1 b4 b5


def _dot(a, b):
    return jnp.dot(a, b, preferred_element_type=jnp.float32)


def _bf16(a):
    return a.astype(MXU_DTYPE)


def _build_slab(arrays, dtype, row_align):
    """Pack many small 2-D tensors into one [rows, cols] slab.  Each piece
    starts at a row offset that is a multiple of `row_align`, so in-kernel
    static ref slices are sublane-tile aligned.  Returns (slab, layout) where
    layout is a tuple of (row_offset, rows, cols)."""
    arrs = []
    for a in arrays:
        a = jnp.asarray(a)
        if a.ndim == 1:
            a = a[None, :]
        arrs.append(a)
    cols = max(int(a.shape[1]) for a in arrs)
    pieces, layout, off = [], [], 0
    for a in arrs:
        r, c = int(a.shape[0]), int(a.shape[1])
        rp = ((r + row_align - 1) // row_align) * row_align
        pieces.append(jnp.pad(a.astype(dtype), ((0, rp - r), (0, cols - c))))
        layout.append((off, r, c))
        off += rp
    return jnp.concatenate(pieces, axis=0), tuple(layout)


# ---------------------------------------------------------------------------
# Fused Pallas kernel: full GNNGI forward for ONE graph (one grid step):
#   initial pooling + NUM_LAYERS MPWGI layers + relu/residual + head.
# ---------------------------------------------------------------------------
def make_gnngi_kernel(num_layers, w_layout, b_layout):
    def kernel(x_ref, ea_ref, gt_ref, gs_ref, gtt_ref, pool_ref,
               invdeg_ref, invn_ref, w_ref, b_ref, out_ref):
        def W(i):
            off, r, c = w_layout[i]
            return w_ref[off:off + r, 0:c]          # bf16, static aligned slice

        def B(i):
            off, r, c = b_layout[i]
            return b_ref[off:off + r, 0:c]          # f32, static aligned slice

        x = x_ref[...]              # [Npg, Cin] f32 node features (padded rows = 0)
        ea = ea_ref[...]            # [Epg, Ec]  bf16 edge attributes
        Gt = gt_ref[...]            # [Epg, Npg] bf16 one-hot(local dst)
        Gs = gs_ref[...]            # [Epg, Npg] bf16 one-hot(local src)
        GtT = gtt_ref[...]          # [Npg, Epg] bf16 Gt^T (precomputed, no XLU transpose)
        pool_row = pool_ref[...]    # [1, Npg]   bf16 valid-node mask
        inv_deg = invdeg_ref[...]   # [Npg, 1]   f32  1/in-degree (1 for isolated/padded)
        inv_n = invn_ref[...]       # [1, 1]     f32  1/num_real_nodes

        # initial global_mean_pool: bf16 one-hot MXU sum + exact f32 VPU scale
        gf = _dot(pool_row, _bf16(x)) * inv_n       # [1, Cg0] f32

        for layer in range(num_layers):
            p = layer * N_W_PER_LAYER
            w1, w2, w3, w4xi, w4xj, w4e, w4g, w5g, w5p = (
                W(p + i) for i in range(N_W_PER_LAYER))
            q = layer * N_B_PER_LAYER
            b1, b4, b5 = B(q), B(q + 1), B(q + 2)

            xb = _bf16(x)
            gb = _bf16(gf)                          # [1, Cg]

            # message(): W4([x_i, x_j, edge_attr, g_i]).  Weight matmuls are
            # applied on the N-sized node features / global vector first, then
            # gathered to E via the one-hot matmuls.  The global term is a
            # per-graph [1,H] constant folded into the target-node gather.
            mxi = _dot(xb, w4xi) + _dot(gb, w4g)    # [Npg, H]
            mxj = _dot(xb, w4xj)                    # [Npg, H]
            msg = (_dot(Gt, _bf16(mxi)) + _dot(Gs, _bf16(mxj))
                   + _dot(ea, w4e) + b4)            # [Epg, H] f32

            # aggr='mean' over incoming edges: bf16 one-hot sum + f32 1/deg
            aggr = _dot(GtT, _bf16(msg)) * inv_deg  # [Npg, H] f32

            # update(): W1(x) + W2(aggr) + W3(global); global term is [1,Cout]
            x_new = (_dot(xb, w1) + (b1 + _dot(gb, w3))
                     + _dot(_bf16(aggr), w2))       # [Npg, Cout] f32

            # global update: W5([global, global_mean_pool(x_new)])
            pooled = _dot(pool_row, _bf16(x_new)) * inv_n      # [1, Cout]
            gf_new = _dot(gb, w5g) + _dot(_bf16(pooled), w5p) + b5

            if layer == 0:
                x = jnp.maximum(x_new, 0.0)
                gf = jnp.maximum(gf_new, 0.0)
            else:
                x = x + jnp.maximum(x_new, 0.0)
                gf = gf + jnp.maximum(gf_new, 0.0)

        # head: Linear(out_channels, 2) + MakePositive (softplus on sigma col).
        lw = W(num_layers * N_W_PER_LAYER)
        lb = B(num_layers * N_B_PER_LAYER)
        y = _dot(_bf16(x), lw) + lb                 # [Npg, 2] f32
        col = jax.lax.broadcasted_iota(jnp.int32, y.shape, 1)
        softplus = jnp.maximum(y, 0.0) + jnp.log1p(jnp.exp(-jnp.abs(y)))
        # TODO(synk): output is 2 of 128 lanes wide (masked stores); tiny byte
        # count so accepted — pad to a 128-wide slab if the head gets wider.
        out_ref[...] = jnp.where(col == 0, y, softplus)   # mu | softplus(sigma)
    return kernel


# ---------------------------------------------------------------------------
# Wrapper: JAX glue (embedding gather, per-graph block construction, weight
# slab packing) + one gridded pallas_call (one graph per grid step).
# ---------------------------------------------------------------------------
@partial(jax.jit, static_argnames=("num_graphs", "max_nodes_per_graph",
                                   "max_edges_per_graph"))
def gnngi_forward(params, x_raw, edge_index, edge_attr, batch_id, *,
                  num_graphs, max_nodes_per_graph, max_edges_per_graph):
    G, N_pg, E_pg = num_graphs, max_nodes_per_graph, max_edges_per_graph

    # EmbedStations: replace station-id column by its embedding vector.
    # TODO(synk): embedding row gather kept in plain JAX glue (index lookup).
    sid = x_raw[:, 0].astype(jnp.int32)
    emb = params["emb_table"][sid]
    x = jnp.concatenate([emb, x_raw[:, 1:]], axis=1).astype(jnp.float32)

    N = x.shape[0]
    E = edge_attr.shape[0]
    src = edge_index[0].astype(jnp.int32)
    dst = edge_index[1].astype(jnp.int32)
    batch_id = batch_id.astype(jnp.int32)

    # ---- per-graph padded blocks. Graphs are independent, so the kernel runs
    # a 1-D "parallel" grid over graphs; selection matrices are per-graph
    # O(N_pg*E_pg) instead of whole-batch O(N*E).
    node_counts = jax.ops.segment_sum(jnp.ones((N,), jnp.int32), batch_id,
                                      num_segments=G)
    node_offsets = jnp.cumsum(node_counts) - node_counts
    node_order = jnp.argsort(batch_id, stable=True)
    local_sorted = (jnp.arange(N, dtype=jnp.int32)
                    - node_offsets[batch_id[node_order]])
    local_node = jnp.zeros((N,), jnp.int32).at[node_order].set(local_sorted)

    e_gid = batch_id[dst]
    edge_counts = jax.ops.segment_sum(jnp.ones((E,), jnp.int32), e_gid,
                                      num_segments=G)
    edge_offsets = jnp.cumsum(edge_counts) - edge_counts
    edge_order = jnp.argsort(e_gid, stable=True)
    e_gid_s = e_gid[edge_order]
    local_edge = jnp.arange(E, dtype=jnp.int32) - edge_offsets[e_gid_s]
    src_s, dst_s = src[edge_order], dst[edge_order]
    ea_s = edge_attr[edge_order].astype(jnp.float32)

    x_blk = jnp.zeros((G, N_pg, x.shape[1]), jnp.float32
                      ).at[batch_id, local_node].set(x)
    mask = jnp.zeros((G, N_pg), jnp.float32).at[batch_id, local_node].set(1.0)
    ea_blk = jnp.zeros((G, E_pg, edge_attr.shape[1]), jnp.float32
                       ).at[e_gid_s, local_edge].set(ea_s)
    gt_blk = jnp.zeros((G, E_pg, N_pg), jnp.float32
                       ).at[e_gid_s, local_edge, local_node[dst_s]].set(1.0)
    gs_blk = jnp.zeros((G, E_pg, N_pg), jnp.float32
                       ).at[e_gid_s, local_edge, local_node[src_s]].set(1.0)

    deg = gt_blk.sum(axis=1)                                       # [G, N_pg]
    inv_deg = (1.0 / jnp.maximum(deg, 1.0))[..., None]             # [G,N_pg,1] f32
    inv_n = (1.0 / jnp.maximum(node_counts.astype(jnp.float32), 1.0)
             )[:, None, None]                                      # [G,1,1]  f32
    pool_row = mask[:, None, :]                                    # [G,1,N_pg]

    # ---- pack all per-layer weights (bf16) / biases (f32) into two slabs.
    w_names = ("W1t", "W2t", "W3t", "W4xit", "W4xjt", "W4et", "W4gt",
               "W5gt", "W5pt")
    w_arrays = [lp[nm] for lp in params["layers"] for nm in w_names]
    w_arrays.append(params["lin_W"].T)
    b_arrays = [lp[nm] for lp in params["layers"] for nm in ("b1", "b4", "b5")]
    b_arrays.append(params["lin_b"])
    w_slab, w_layout = _build_slab(w_arrays, MXU_DTYPE, row_align=16)
    b_slab, b_layout = _build_slab(b_arrays, jnp.float32, row_align=8)

    num_layers = len(params["layers"])
    kernel = make_gnngi_kernel(num_layers, w_layout, b_layout)

    def per_graph(arr):
        zeros = (0,) * (arr.ndim - 1)
        return pl.BlockSpec((None,) + arr.shape[1:], lambda g: (g,) + zeros)

    def whole(arr):
        zeros = (0,) * arr.ndim
        return pl.BlockSpec(arr.shape, lambda g: zeros)

    args = (x_blk,
            _bf16(ea_blk), _bf16(gt_blk), _bf16(gs_blk),
            _bf16(jnp.swapaxes(gt_blk, 1, 2)),
            _bf16(pool_row),
            inv_deg, inv_n, w_slab, b_slab)

    out_blk = pl.pallas_call(
        kernel,
        out_shape=jax.ShapeDtypeStruct((G, N_pg, 2), jnp.float32),
        grid=(G,),
        in_specs=[per_graph(args[0]), per_graph(args[1]), per_graph(args[2]),
                  per_graph(args[3]), per_graph(args[4]), per_graph(args[5]),
                  per_graph(args[6]), per_graph(args[7]),
                  whole(args[8]), whole(args[9])],
        out_specs=pl.BlockSpec((None, N_pg, 2), lambda g: (g, 0, 0)),
        compiler_params=pltpu.CompilerParams(
            dimension_semantics=("parallel",),
            vmem_limit_bytes=32 * 1024 * 1024),
    )(*args)

    # gather the padded per-graph rows back into the original node order
    return out_blk[batch_id, local_node]


# ---------------------------------------------------------------------------
# Parameters (deterministic, PyTorch-Linear-style init); stored in f32.
# ---------------------------------------------------------------------------
def linear_init(key, in_dim, out_dim, bias=True):
    kw, kb = jax.random.split(key)
    bound = 1.0 / math.sqrt(in_dim)
    W = jax.random.uniform(kw, (out_dim, in_dim), jnp.float32, -bound, bound)
    b = (jax.random.uniform(kb, (out_dim,), jnp.float32, -bound, bound)
         if bias else jnp.zeros((out_dim,), jnp.float32))
    return W, b


def make_layer_params(key, c_in, e_ch, c_g, h, c_out, g_out):
    ks = jax.random.split(key, 5)
    W1, b1 = linear_init(ks[0], c_in, c_out)
    W2, _ = linear_init(ks[1], h, c_out, bias=False)
    W3, _ = linear_init(ks[2], c_g, c_out, bias=False)
    W4, b4 = linear_init(ks[3], 2 * c_in + e_ch + c_g, h)
    W5, b5 = linear_init(ks[4], h + c_g, g_out)
    return dict(
        W1t=W1.T, b1=b1[None, :],
        W2t=W2.T, W3t=W3.T,
        W4xit=W4[:, :c_in].T,
        W4xjt=W4[:, c_in:2 * c_in].T,
        W4et=W4[:, 2 * c_in:2 * c_in + e_ch].T,
        W4gt=W4[:, 2 * c_in + e_ch:].T,
        b4=b4[None, :],
        W5gt=W5[:, :c_g].T,          # W5 input order is [global_features, pooled]
        W5pt=W5[:, c_g:].T,
        b5=b5[None, :],
    )


# ---------------------------------------------------------------------------
# Pure-JAX f32 reference (index-based scatter/gather) for verification
# ---------------------------------------------------------------------------
def gnngi_reference(params, x_raw, edge_index, edge_attr, batch_id, num_graphs):
    sid = x_raw[:, 0].astype(jnp.int32)
    emb = params["emb_table"][sid]
    x = jnp.concatenate([emb, x_raw[:, 1:]], axis=1)
    N = x.shape[0]
    src, dst = edge_index[0], edge_index[1]

    def segment_mean(vals, ids, num):
        s = jax.ops.segment_sum(vals, ids, num)
        c = jax.ops.segment_sum(jnp.ones((vals.shape[0], 1), vals.dtype), ids, num)
        return s / jnp.maximum(c, 1.0)

    def layer(lp, xx, gf):
        gpn = gf[batch_id]
        xi, xj, gi = xx[dst], xx[src], gpn[dst]
        msg = (xi @ lp["W4xit"] + xj @ lp["W4xjt"] + edge_attr @ lp["W4et"]
               + gi @ lp["W4gt"] + lp["b4"])
        aggr = segment_mean(msg, dst, N)
        x_new = xx @ lp["W1t"] + lp["b1"] + aggr @ lp["W2t"] + gpn @ lp["W3t"]
        pooled = segment_mean(x_new, batch_id, num_graphs)
        gf_new = gf @ lp["W5gt"] + pooled @ lp["W5pt"] + lp["b5"]
        return x_new, gf_new

    gf = segment_mean(x, batch_id, num_graphs)
    x0, g0 = layer(params["layers"][0], x, gf)
    x = jax.nn.relu(x0)
    gf = jax.nn.relu(g0)
    for lp in params["layers"][1:]:
        xn, gn = layer(lp, x, gf)
        x = x + jax.nn.relu(xn)
        gf = gf + jax.nn.relu(gn)
    y = x @ params["lin_W"].T + params["lin_b"]
    return jnp.concatenate([y[:, :1], jax.nn.softplus(y[:, 1:])], axis=1)


if __name__ == "__main__":
    key = jax.random.PRNGKey(0)
    k_emb, k_layers, k_lin, k_x, k_e, k_ea = jax.random.split(key, 6)

    # --- parameters (deterministic) ---
    emb_table = 0.1 * jax.random.normal(k_emb, (NUM_STATIONS, EMB_DIM), jnp.float32)
    layer_keys = jax.random.split(k_layers, NUM_LAYERS)
    layers = []
    c_in, c_g = IN_CH, GLOBAL_CH
    for i in range(NUM_LAYERS):
        layers.append(make_layer_params(layer_keys[i], c_in, EDGE_CH, c_g,
                                        HIDDEN_CH, OUT_CH, GLOBAL_OUT_CH))
        c_in, c_g = OUT_CH, GLOBAL_OUT_CH
    lin_W, lin_b = linear_init(k_lin, OUT_CH, 2)
    params = dict(emb_table=emb_table, layers=layers, lin_W=lin_W, lin_b=lin_b)

    # --- inputs: 2 graphs x 8 nodes, 16 edges per graph ---
    # TODO(synk): real deployments should batch many graphs per call so the
    # per-graph grid has many "parallel" steps and rows fill MXU sublanes.
    N_PER_G, G, E_PER_G = 8, 2, 16
    N = N_PER_G * G
    ks, kf = jax.random.split(k_x)
    station_ids = jax.random.randint(ks, (N,), 0, NUM_STATIONS)
    feats = jax.random.normal(kf, (N, F_RAW - 1), jnp.float32)
    x_raw = jnp.concatenate([station_ids[:, None].astype(jnp.float32), feats], axis=1)

    e_keys = jax.random.split(k_e, 2 * G)
    srcs, dsts = [], []
    for g in range(G):
        srcs.append(jax.random.randint(e_keys[2 * g], (E_PER_G,), 0, N_PER_G) + g * N_PER_G)
        dsts.append(jax.random.randint(e_keys[2 * g + 1], (E_PER_G,), 0, N_PER_G) + g * N_PER_G)
    edge_index = jnp.stack([jnp.concatenate(srcs), jnp.concatenate(dsts)], axis=0)
    edge_attr = jax.random.normal(k_ea, (E_PER_G * G, EDGE_CH), jnp.float32)
    batch_id = jnp.repeat(jnp.arange(G), N_PER_G)

    out = gnngi_forward(params, x_raw, edge_index, edge_attr, batch_id,
                        num_graphs=G, max_nodes_per_graph=N_PER_G,
                        max_edges_per_graph=E_PER_G)
    out = jax.block_until_ready(out)

    ref = gnngi_reference(params, x_raw, edge_index, edge_attr, batch_id, G)
    np.testing.assert_allclose(np.asarray(out), np.asarray(ref), rtol=5e-2, atol=5e-2)
    print("KERNEL_OK")
</pallas_src>

<mosaic_0001>
module attributes {stable_mosaic.version = 11 : i64} {
  func.func private @main(%arg0: i32) attributes {dimension_semantics = [#tpu.dimension_semantics<core_parallel>], iteration_bounds = array<i64: 2>, tpu.core_type = #tpu.core_type<sc_scalar_subcore>, window_params = []} {
    return
  }
}

module attributes {stable_mosaic.version = 11 : i64} {
  func.func private @main(%arg0: i32) attributes {dimension_semantics = [#tpu.dimension_semantics<core_parallel>], iteration_bounds = array<i64: 2>, tpu.core_type = #tpu.core_type<sc_scalar_subcore>, window_params = []} {
    return
  }
}

module attributes {stable_mosaic.version = 11 : i64} {
  func.func @kernel(%arg0: i32, %arg1: memref<1x8x12xf32, #tpu.memory_space<vmem>>, %arg2: memref<1x16x3xbf16, #tpu.memory_space<vmem>>, %arg3: memref<1x16x8xbf16, #tpu.memory_space<vmem>>, %arg4: memref<1x16x8xbf16, #tpu.memory_space<vmem>>, %arg5: memref<1x8x16xbf16, #tpu.memory_space<vmem>>, %arg6: memref<1x1x8xbf16, #tpu.memory_space<vmem>>, %arg7: memref<1x8x1xf32, #tpu.memory_space<vmem>>, %arg8: memref<1x1x1xf32, #tpu.memory_space<vmem>>, %arg9: memref<304x16xbf16, #tpu.memory_space<vmem>>, %arg10: memref<56x16xf32, #tpu.memory_space<vmem>>, %arg11: memref<1x8x2xf32, #tpu.memory_space<vmem>>) attributes {dimension_semantics = [#tpu.dimension_semantics<parallel>], iteration_bounds = array<i64: 2>, scalar_prefetch = 0 : i64, scratch_operands = 0 : i64, tpu.core_type = #tpu.core_type<tc>, window_params = [{transform_indices = @transform_0, window_bounds = array<i64: 1, 8, 12>}, {transform_indices = @transform_1, window_bounds = array<i64: 1, 16, 3>}, {transform_indices = @transform_2, window_bounds = array<i64: 1, 16, 8>}, {transform_indices = @transform_3, window_bounds = array<i64: 1, 16, 8>}, {transform_indices = @transform_4, window_bounds = array<i64: 1, 8, 16>}, {transform_indices = @transform_5, window_bounds = array<i64: 1, 1, 8>}, {transform_indices = @transform_6, window_bounds = array<i64: 1, 8, 1>}, {transform_indices = @transform_7, window_bounds = array<i64: 1, 1, 1>}, {pipeline_mode = #tpu.pipeline_mode<synchronous>, transform_indices = @transform_8, window_bounds = array<i64: 304, 16>}, {pipeline_mode = #tpu.pipeline_mode<synchronous>, transform_indices = @transform_9, window_bounds = array<i64: 56, 16>}, {transform_indices = @transform_10, window_bounds = array<i64: 1, 8, 2>}]} {
    %c0 = arith.constant 0 : index
    %c0_0 = arith.constant 0 : index
    %c0_1 = arith.constant 0 : index
    %0 = vector.load %arg1[%c0, %c0_0, %c0_1] : memref<1x8x12xf32, #tpu.memory_space<vmem>>, vector<1x8x12xf32>
    %1 = vector.shape_cast %0 : vector<1x8x12xf32> to vector<8x12xf32>
    %c0_2 = arith.constant 0 : index
    %c0_3 = arith.constant 0 : index
    %c0_4 = arith.constant 0 : index
    %2 = vector.load %arg2[%c0_2, %c0_3, %c0_4] : memref<1x16x3xbf16, #tpu.memory_space<vmem>>, vector<1x16x3xbf16>
    %3 = vector.shape_cast %2 : vector<1x16x3xbf16> to vector<16x3xbf16>
    %c0_5 = arith.constant 0 : index
    %c0_6 = arith.constant 0 : index
    %c0_7 = arith.constant 0 : index
    %4 = vector.load %arg3[%c0_5, %c0_6, %c0_7] : memref<1x16x8xbf16, #tpu.memory_space<vmem>>, vector<1x16x8xbf16>
    %5 = vector.shape_cast %4 : vector<1x16x8xbf16> to vector<16x8xbf16>
    %c0_8 = arith.constant 0 : index
    %c0_9 = arith.constant 0 : index
    %c0_10 = arith.constant 0 : index
    %6 = vector.load %arg4[%c0_8, %c0_9, %c0_10] : memref<1x16x8xbf16, #tpu.memory_space<vmem>>, vector<1x16x8xbf16>
    %7 = vector.shape_cast %6 : vector<1x16x8xbf16> to vector<16x8xbf16>
    %c0_11 = arith.constant 0 : index
    %c0_12 = arith.constant 0 : index
    %c0_13 = arith.constant 0 : index
    %8 = vector.load %arg5[%c0_11, %c0_12, %c0_13] : memref<1x8x16xbf16, #tpu.memory_space<vmem>>, vector<1x8x16xbf16>
    %9 = vector.shape_cast %8 : vector<1x8x16xbf16> to vector<8x16xbf16>
    %c0_14 = arith.constant 0 : index
    %c0_15 = arith.constant 0 : index
    %c0_16 = arith.constant 0 : index
    %10 = vector.load %arg6[%c0_14, %c0_15, %c0_16] : memref<1x1x8xbf16, #tpu.memory_space<vmem>>, vector<1x1x8xbf16>
    %11 = vector.shape_cast %10 : vector<1x1x8xbf16> to vector<1x8xbf16>
    %c0_17 = arith.constant 0 : index
    %c0_18 = arith.constant 0 : index
    %c0_19 = arith.constant 0 : index
    %12 = vector.load %arg7[%c0_17, %c0_18, %c0_19] : memref<1x8x1xf32, #tpu.memory_space<vmem>>, vector<1x8x1xf32>
    %13 = vector.shape_cast %12 : vector<1x8x1xf32> to vector<8x1xf32>
    %c0_20 = arith.constant 0 : index
    %c0_21 = arith.constant 0 : index
    %c0_22 = arith.constant 0 : index
    %14 = vector.load %arg8[%c0_20, %c0_21, %c0_22] : memref<1x1x1xf32, #tpu.memory_space<vmem>>, vector<1x1x1xf32>
    %15 = vector.shape_cast %14 : vector<1x1x1xf32> to vector<1x1xf32>
    %16 = arith.truncf %1 : vector<8x12xf32> to vector<8x12xbf16>
    %cst = arith.constant dense<0.000000e+00> : vector<1x12xf32>
    %17 = tpu.matmul %11, %16, %cst {dimension_numbers = #tpu.dot_dimension_numbers<[1], [0], [0], [1], [0, 0, 1, 1], [], []>} : vector<1x8xbf16>, vector<8x12xbf16>, vector<1x12xf32> -> vector<1x12xf32>
    %18 = vector.broadcast %15 : vector<1x1xf32> to vector<1x12xf32>
    %19 = arith.mulf %17, %18 : vector<1x12xf32>
    %c0_23 = arith.constant 0 : index
    %c0_24 = arith.constant 0 : index
    %20 = vector.load %arg9[%c0_23, %c0_24] : memref<304x16xbf16, #tpu.memory_space<vmem>>, vector<12x16xbf16>
    %c16 = arith.constant 16 : index
    %c0_25 = arith.constant 0 : index
    %21 = vector.load %arg9[%c16, %c0_25] : memref<304x16xbf16, #tpu.memory_space<vmem>>, vector<16x16xbf16>
    %c32 = arith.constant 32 : index
    %c0_26 = arith.constant 0 : index
    %22 = vector.load %arg9[%c32, %c0_26] : memref<304x16xbf16, #tpu.memory_space<vmem>>, vector<12x16xbf16>
    %c48 = arith.constant 48 : index
    %c0_27 = arith.constant 0 : index
    %23 = vector.load %arg9[%c48, %c0_27] : memref<304x16xbf16, #tpu.memory_space<vmem>>, vector<12x16xbf16>
    %c64 = arith.constant 64 : index
    %c0_28 = arith.constant 0 : index
    %24 = vector.load %arg9[%c64, %c0_28] : memref<304x16xbf16, #tpu.memory_space<vmem>>, vector<12x16xbf16>
    %c80 = arith.constant 80 : index
    %c0_29 = arith.constant 0 : index
    %25 = vector.load %arg9[%c80, %c0_29] : memref<304x16xbf16, #tpu.memory_space<vmem>>, vector<3x16xbf16>
    %c96 = arith.constant 96 : index
    %c0_30 = arith.constant 0 : index
    %26 = vector.load %arg9[%c96, %c0_30] : memref<304x16xbf16, #tpu.memory_space<vmem>>, vector<12x16xbf16>
    %c112 = arith.constant 112 : index
    %c0_31 = arith.constant 0 : index
    %27 = vector.load %arg9[%c112, %c0_31] : memref<304x16xbf16, #tpu.memory_space<vmem>>, vector<12x10xbf16>
    %c128 = arith.constant 128 : index
    %c0_32 = arith.constant 0 : index
    %28 = vector.load %arg9[%c128, %c0_32] : memref<304x16xbf16, #tpu.memory_space<vmem>>, vector<16x10xbf16>
    %c0_33 = arith.constant 0 : index
    %c0_34 = arith.constant 0 : index
    %29 = vector.load %arg10[%c0_33, %c0_34] : memref<56x16xf32, #tpu.memory_space<vmem>>, vector<1x16xf32>
    %c8 = arith.constant 8 : index
    %c0_35 = arith.constant 0 : index
    %30 = vector.load %arg10[%c8, %c0_35] : memref<56x16xf32, #tpu.memory_space<vmem>>, vector<1x16xf32>
    %c16_36 = arith.constant 16 : index
    %c0_37 = arith.constant 0 : index
    %31 = vector.load %arg10[%c16_36, %c0_37] : memref<56x16xf32, #tpu.memory_space<vmem>>, vector<1x10xf32>
    %32 = arith.truncf %1 : vector<8x12xf32> to vector<8x12xbf16>
    %33 = arith.truncf %19 : vector<1x12xf32> to vector<1x12xbf16>
    %cst_38 = arith.constant dense<0.000000e+00> : vector<8x16xf32>
    %34 = tpu.matmul %32, %23, %cst_38 {dimension_numbers = #tpu.dot_dimension_numbers<[1], [0], [0], [1], [0, 0, 1, 1], [], []>} : vector<8x12xbf16>, vector<12x16xbf16>, vector<8x16xf32> -> vector<8x16xf32>
    %cst_39 = arith.constant dense<0.000000e+00> : vector<1x16xf32>
    %35 = tpu.matmul %33, %26, %cst_39 {dimension_numbers = #tpu.dot_dimension_numbers<[1], [0], [0], [1], [0, 0, 1, 1], [], []>} : vector<1x12xbf16>, vector<12x16xbf16>, vector<1x16xf32> -> vector<1x16xf32>
    %36 = vector.broadcast %35 : vector<1x16xf32> to vector<8x16xf32>
    %37 = arith.addf %34, %36 : vector<8x16xf32>
    %cst_40 = arith.constant dense<0.000000e+00> : vector<8x16xf32>
    %38 = tpu.matmul %32, %24, %cst_40 {dimension_numbers = #tpu.dot_dimension_numbers<[1], [0], [0], [1], [0, 0, 1, 1], [], []>} : vector<8x12xbf16>, vector<12x16xbf16>, vector<8x16xf32> -> vector<8x16xf32>
    %39 = arith.truncf %37 : vector<8x16xf32> to vector<8x16xbf16>
    %cst_41 = arith.constant dense<0.000000e+00> : vector<16x16xf32>
    %40 = tpu.matmul %5, %39, %cst_41 {dimension_numbers = #tpu.dot_dimension_numbers<[1], [0], [0], [1], [0, 0, 1, 1], [], []>} : vector<16x8xbf16>, vector<8x16xbf16>, vector<16x16xf32> -> vector<16x16xf32>
    %41 = arith.truncf %38 : vector<8x16xf32> to vector<8x16xbf16>
    %cst_42 = arith.constant dense<0.000000e+00> : vector<16x16xf32>
    %42 = tpu.matmul %7, %41, %cst_42 {dimension_numbers = #tpu.dot_dimension_numbers<[1], [0], [0], [1], [0, 0, 1, 1], [], []>} : vector<16x8xbf16>, vector<8x16xbf16>, vector<16x16xf32> -> vector<16x16xf32>
    %43 = arith.addf %40, %42 : vector<16x16xf32>
    %cst_43 = arith.constant dense<0.000000e+00> : vector<16x16xf32>
    %44 = tpu.matmul %3, %25, %cst_43 {dimension_numbers = #tpu.dot_dimension_numbers<[1], [0], [0], [1], [0, 0, 1, 1], [], []>} : vector<16x3xbf16>, vector<3x16xbf16>, vector<16x16xf32> -> vector<16x16xf32>
    %45 = arith.addf %43, %44 : vector<16x16xf32>
    %46 = vector.broadcast %30 : vector<1x16xf32> to vector<16x16xf32>
    %47 = arith.addf %45, %46 : vector<16x16xf32>
    %48 = arith.truncf %47 : vector<16x16xf32> to vector<16x16xbf16>
    %cst_44 = arith.constant dense<0.000000e+00> : vector<8x16xf32>
    %49 = tpu.matmul %9, %48, %cst_44 {dimension_numbers = #tpu.dot_dimension_numbers<[1], [0], [0], [1], [0, 0, 1, 1], [], []>} : vector<8x16xbf16>, vector<16x16xbf16>, vector<8x16xf32> -> vector<8x16xf32>
    %50 = vector.broadcast %13 : vector<8x1xf32> to vector<8x16xf32>
    %51 = arith.mulf %49, %50 : vector<8x16xf32>
    %cst_45 = arith.constant dense<0.000000e+00> : vector<8x16xf32>
    %52 = tpu.matmul %32, %20, %cst_45 {dimension_numbers = #tpu.dot_dimension_numbers<[1], [0], [0], [1], [0, 0, 1, 1], [], []>} : vector<8x12xbf16>, vector<12x16xbf16>, vector<8x16xf32> -> vector<8x16xf32>
    %cst_46 = arith.constant dense<0.000000e+00> : vector<1x16xf32>
    %53 = tpu.matmul %33, %22, %cst_46 {dimension_numbers = #tpu.dot_dimension_numbers<[1], [0], [0], [1], [0, 0, 1, 1], [], []>} : vector<1x12xbf16>, vector<12x16xbf16>, vector<1x16xf32> -> vector<1x16xf32>
    %54 = arith.addf %29, %53 : vector<1x16xf32>
    %55 = vector.broadcast %54 : vector<1x16xf32> to vector<8x16xf32>
    %56 = arith.addf %52, %55 : vector<8x16xf32>
    %57 = arith.truncf %51 : vector<8x16xf32> to vector<8x16xbf16>
    %cst_47 = arith.constant dense<0.000000e+00> : vector<8x16xf32>
    %58 = tpu.matmul %57, %21, %cst_47 {dimension_numbers = #tpu.dot_dimension_numbers<[1], [0], [0], [1], [0, 0, 1, 1], [], []>} : vector<8x16xbf16>, vector<16x16xbf16>, vector<8x16xf32> -> vector<8x16xf32>
    %59 = arith.addf %56, %58 : vector<8x16xf32>
    %60 = arith.truncf %59 : vector<8x16xf32> to vector<8x16xbf16>
    %cst_48 = arith.constant dense<0.000000e+00> : vector<1x16xf32>
    %61 = tpu.matmul %11, %60, %cst_48 {dimension_numbers = #tpu.dot_dimension_numbers<[1], [0], [0], [1], [0, 0, 1, 1], [], []>} : vector<1x8xbf16>, vector<8x16xbf16>, vector<1x16xf32> -> vector<1x16xf32>
    %62 = vector.broadcast %15 : vector<1x1xf32> to vector<1x16xf32>
    %63 = arith.mulf %61, %62 : vector<1x16xf32>
    %cst_49 = arith.constant dense<0.000000e+00> : vector<1x10xf32>
    %64 = tpu.matmul %33, %27, %cst_49 {dimension_numbers = #tpu.dot_dimension_numbers<[1], [0], [0], [1], [0, 0, 1, 1], [], []>} : vector<1x12xbf16>, vector<12x10xbf16>, vector<1x10xf32> -> vector<1x10xf32>
    %65 = arith.truncf %63 : vector<1x16xf32> to vector<1x16xbf16>
    %cst_50 = arith.constant dense<0.000000e+00> : vector<1x10xf32>
    %66 = tpu.matmul %65, %28, %cst_50 {dimension_numbers = #tpu.dot_dimension_numbers<[1], [0], [0], [1], [0, 0, 1, 1], [], []>} : vector<1x16xbf16>, vector<16x10xbf16>, vector<1x10xf32> -> vector<1x10xf32>
    %67 = arith.addf %64, %66 : vector<1x10xf32>
    %68 = arith.addf %67, %31 : vector<1x10xf32>
    %cst_51 = arith.constant 0.000000e+00 : f32
    %69 = vector.broadcast %cst_51 : f32 to vector<8x16xf32>
    %70 = arith.maximumf %59, %69 : vector<8x16xf32>
    %cst_52 = arith.constant 0.000000e+00 : f32
    %71 = vector.broadcast %cst_52 : f32 to vector<1x10xf32>
    %72 = arith.maximumf %68, %71 : vector<1x10xf32>
    %c144 = arith.constant 144 : index
    %c0_53 = arith.constant 0 : index
    %73 = vector.load %arg9[%c144, %c0_53] : memref<304x16xbf16, #tpu.memory_space<vmem>>, vector<16x16xbf16>
    %c160 = arith.constant 160 : index
    %c0_54 = arith.constant 0 : index
    %74 = vector.load %arg9[%c160, %c0_54] : memref<304x16xbf16, #tpu.memory_space<vmem>>, vector<16x16xbf16>
    %c176 = arith.constant 176 : index
    %c0_55 = arith.constant 0 : index
    %75 = vector.load %arg9[%c176, %c0_55] : memref<304x16xbf16, #tpu.memory_space<vmem>>, vector<10x16xbf16>
    %c192 = arith.constant 192 : index
    %c0_56 = arith.constant 0 : index
    %76 = vector.load %arg9[%c192, %c0_56] : memref<304x16xbf16, #tpu.memory_space<vmem>>, vector<16x16xbf16>
    %c208 = arith.constant 208 : index
    %c0_57 = arith.constant 0 : index
    %77 = vector.load %arg9[%c208, %c0_57] : memref<304x16xbf16, #tpu.memory_space<vmem>>, vector<16x16xbf16>
    %c224 = arith.constant 224 : index
    %c0_58 = arith.constant 0 : index
    %78 = vector.load %arg9[%c224, %c0_58] : memref<304x16xbf16, #tpu.memory_space<vmem>>, vector<3x16xbf16>
    %c240 = arith.constant 240 : index
    %c0_59 = arith.constant 0 : index
    %79 = vector.load %arg9[%c240, %c0_59] : memref<304x16xbf16, #tpu.memory_space<vmem>>, vector<10x16xbf16>
    %c24 = arith.constant 24 : index
    %c0_60 = arith.constant 0 : index
    %80 = vector.load %arg10[%c24, %c0_60] : memref<56x16xf32, #tpu.memory_space<vmem>>, vector<1x16xf32>
    %c32_61 = arith.constant 32 : index
    %c0_62 = arith.constant 0 : index
    %81 = vector.load %arg10[%c32_61, %c0_62] : memref<56x16xf32, #tpu.memory_space<vmem>>, vector<1x16xf32>
    %82 = arith.truncf %70 : vector<8x16xf32> to vector<8x16xbf16>
    %83 = arith.truncf %72 : vector<1x10xf32> to vector<1x10xbf16>
    %cst_63 = arith.constant dense<0.000000e+00> : vector<8x16xf32>
    %84 = tpu.matmul %82, %76, %cst_63 {dimension_numbers = #tpu.dot_dimension_numbers<[1], [0], [0], [1], [0, 0, 1, 1], [], []>} : vector<8x16xbf16>, vector<16x16xbf16>, vector<8x16xf32> -> vector<8x16xf32>
    %cst_64 = arith.constant dense<0.000000e+00> : vector<1x16xf32>
    %85 = tpu.matmul %83, %79, %cst_64 {dimension_numbers = #tpu.dot_dimension_numbers<[1], [0], [0], [1], [0, 0, 1, 1], [], []>} : vector<1x10xbf16>, vector<10x16xbf16>, vector<1x16xf32> -> vector<1x16xf32>
    %86 = vector.broadcast %85 : vector<1x16xf32> to vector<8x16xf32>
    %87 = arith.addf %84, %86 : vector<8x16xf32>
    %cst_65 = arith.constant dense<0.000000e+00> : vector<8x16xf32>
    %88 = tpu.matmul %82, %77, %cst_65 {dimension_numbers = #tpu.dot_dimension_numbers<[1], [0], [0], [1], [0, 0, 1, 1], [], []>} : vector<8x16xbf16>, vector<16x16xbf16>, vector<8x16xf32> -> vector<8x16xf32>
    %89 = arith.truncf %87 : vector<8x16xf32> to vector<8x16xbf16>
    %cst_66 = arith.constant dense<0.000000e+00> : vector<16x16xf32>
    %90 = tpu.matmul %5, %89, %cst_66 {dimension_numbers = #tpu.dot_dimension_numbers<[1], [0], [0], [1], [0, 0, 1, 1], [], []>} : vector<16x8xbf16>, vector<8x16xbf16>, vector<16x16xf32> -> vector<16x16xf32>
    %91 = arith.truncf %88 : vector<8x16xf32> to vector<8x16xbf16>
    %cst_67 = arith.constant dense<0.000000e+00> : vector<16x16xf32>
    %92 = tpu.matmul %7, %91, %cst_67 {dimension_numbers = #tpu.dot_dimension_numbers<[1], [0], [0], [1], [0, 0, 1, 1], [], []>} : vector<16x8xbf16>, vector<8x16xbf16>, vector<16x16xf32> -> vector<16x16xf32>
    %93 = arith.addf %90, %92 : vector<16x16xf32>
    %cst_68 = arith.constant dense<0.000000e+00> : vector<16x16xf32>
    %94 = tpu.matmul %3, %78, %cst_68 {dimension_numbers = #tpu.dot_dimension_numbers<[1], [0], [0], [1], [0, 0, 1, 1], [], []>} : vector<16x3xbf16>, vector<3x16xbf16>, vector<16x16xf32> -> vector<16x16xf32>
    %95 = arith.addf %93, %94 : vector<16x16xf32>
    %96 = vector.broadcast %81 : vector<1x16xf32> to vector<16x16xf32>
    %97 = arith.addf %95, %96 : vector<16x16xf32>
    %98 = arith.truncf %97 : vector<16x16xf32> to vector<16x16xbf16>
    %cst_69 = arith.constant dense<0.000000e+00> : vector<8x16xf32>
    %99 = tpu.matmul %9, %98, %cst_69 {dimension_numbers = #tpu.dot_dimension_numbers<[1], [0], [0], [1], [0, 0, 1, 1], [], []>} : vector<8x16xbf16>, vector<16x16xbf16>, vector<8x16xf32> -> vector<8x16xf32>
    %100 = vector.broadcast %13 : vector<8x1xf32> to vector<8x16xf32>
    %101 = arith.mulf %99, %100 : vector<8x16xf32>
    %cst_70 = arith.constant dense<0.000000e+00> : vector<8x16xf32>
    %102 = tpu.matmul %82, %73, %cst_70 {dimension_numbers = #tpu.dot_dimension_numbers<[1], [0], [0], [1], [0, 0, 1, 1], [], []>} : vector<8x16xbf16>, vector<16x16xbf16>, vector<8x16xf32> -> vector<8x16xf32>
    %cst_71 = arith.constant dense<0.000000e+00> : vector<1x16xf32>
    %103 = tpu.matmul %83, %75, %cst_71 {dimension_numbers = #tpu.dot_dimension_numbers<[1], [0], [0], [1], [0, 0, 1, 1], [], []>} : vector<1x10xbf16>, vector<10x16xbf16>, vector<1x16xf32> -> vector<1x16xf32>
    %104 = arith.addf %80, %103 : vector<1x16xf32>
    %105 = vector.broadcast %104 : vector<1x16xf32> to vector<8x16xf32>
    %106 = arith.addf %102, %105 : vector<8x16xf32>
    %107 = arith.truncf %101 : vector<8x16xf32> to vector<8x16xbf16>
    %cst_72 = arith.constant dense<0.000000e+00> : vector<8x16xf32>
    %108 = tpu.matmul %107, %74, %cst_72 {dimension_numbers = #tpu.dot_dimension_numbers<[1], [0], [0], [1], [0, 0, 1, 1], [], []>} : vector<8x16xbf16>, vector<16x16xbf16>, vector<8x16xf32> -> vector<8x16xf32>
    %109 = arith.addf %106, %108 : vector<8x16xf32>
    %cst_73 = arith.constant 0.000000e+00 : f32
    %110 = vector.broadcast %cst_73 : f32 to vector<8x16xf32>
    %111 = arith.maximumf %109, %110 : vector<8x16xf32>
    %112 = arith.addf %70, %111 : vector<8x16xf32>
    %c288 = arith.constant 288 : index
    %c0_74 = arith.constant 0 : index
    %113 = vector.load %arg9[%c288, %c0_74] : memref<304x16xbf16, #tpu.memory_space<vmem>>, vector<16x2xbf16>
    %c48_75 = arith.constant 48 : index
    %c0_76 = arith.constant 0 : index
    %114 = vector.load %arg10[%c48_75, %c0_76] : memref<56x16xf32, #tpu.memory_space<vmem>>, vector<1x2xf32>
    %115 = arith.truncf %112 : vector<8x16xf32> to vector<8x16xbf16>
    %cst_77 = arith.constant dense<0.000000e+00> : vector<8x2xf32>
    %116 = tpu.matmul %115, %113, %cst_77 {dimension_numbers = #tpu.dot_dimension_numbers<[1], [0], [0], [1], [0, 0, 1, 1], [], []>} : vector<8x16xbf16>, vector<16x2xbf16>, vector<8x2xf32> -> vector<8x2xf32>
    %117 = vector.broadcast %114 : vector<1x2xf32> to vector<8x2xf32>
    %118 = arith.addf %116, %117 : vector<8x2xf32>
    %119 = tpu.iota {dimensions = array<i32: 1>} : vector<8x2xi32>
    %cst_78 = arith.constant 0.000000e+00 : f32
    %120 = vector.broadcast %cst_78 : f32 to vector<8x2xf32>
    %121 = arith.maximumf %118, %120 : vector<8x2xf32>
    %122 = math.absf %118 : vector<8x2xf32>
    %cst_79 = arith.constant 0.000000e+00 : f32
    %123 = vector.broadcast %cst_79 : f32 to vector<8x2xf32>
    %124 = arith.subf %123, %122 : vector<8x2xf32>
    %125 = math.exp %124 : vector<8x2xf32>
    %126 = math.log1p %125 : vector<8x2xf32>
    %127 = arith.addf %121, %126 : vector<8x2xf32>
    %c0_i32 = arith.constant 0 : i32
    %128 = vector.broadcast %c0_i32 : i32 to vector<8x2xi32>
    %129 = arith.cmpi eq, %119, %128 : vector<8x2xi32>
    %130 = arith.select %129, %118, %127 : vector<8x2xi1>, vector<8x2xf32>
    %c0_80 = arith.constant 0 : index
    %c0_81 = arith.constant 0 : index
    %c0_82 = arith.constant 0 : index
    %131 = vector.load %arg11[%c0_80, %c0_81, %c0_82] : memref<1x8x2xf32, #tpu.memory_space<vmem>>, vector<1x8x2xf32>
    %132 = vector.shape_cast %131 : vector<1x8x2xf32> to vector<8x2xf32>
    %133 = vector.shape_cast %130 : vector<8x2xf32> to vector<1x8x2xf32>
    tpu.vector_store %arg11[%c0_80, %c0_81, %c0_82], %133 {strides = array<i32>} : memref<1x8x2xf32, #tpu.memory_space<vmem>>, vector<1x8x2xf32>,
    return
  }
  func.func @transform_0(%arg0: i32) -> (i32, i32, i32) {
    %c0_i32 = arith.constant 0 : i32
    %c0_i32_0 = arith.constant 0 : i32
    %c0_i32_1 = arith.constant 0 : i32
    return %arg0, %c0_i32, %c0_i32_0 : i32, i32, i32
  }
  func.func @transform_1(%arg0: i32) -> (i32, i32, i32) {
    %c0_i32 = arith.constant 0 : i32
    %c0_i32_0 = arith.constant 0 : i32
    %c0_i32_1 = arith.constant 0 : i32
    return %arg0, %c0_i32, %c0_i32_0 : i32, i32, i32
  }
  func.func @transform_2(%arg0: i32) -> (i32, i32, i32) {
    %c0_i32 = arith.constant 0 : i32
    %c0_i32_0 = arith.constant 0 : i32
    %c0_i32_1 = arith.constant 0 : i32
    return %arg0, %c0_i32, %c0_i32_0 : i32, i32, i32
  }
  func.func @transform_3(%arg0: i32) -> (i32, i32, i32) {
    %c0_i32 = arith.constant 0 : i32
    %c0_i32_0 = arith.constant 0 : i32
    %c0_i32_1 = arith.constant 0 : i32
    return %arg0, %c0_i32, %c0_i32_0 : i32, i32, i32
  }
  func.func @transform_4(%arg0: i32) -> (i32, i32, i32) {
    %c0_i32 = arith.constant 0 : i32
    %c0_i32_0 = arith.constant 0 : i32
    %c0_i32_1 = arith.constant 0 : i32
    return %arg0, %c0_i32, %c0_i32_0 : i32, i32, i32
  }
  func.func @transform_5(%arg0: i32) -> (i32, i32, i32) {
    %c0_i32 = arith.constant 0 : i32
    %c0_i32_0 = arith.constant 0 : i32
    %c0_i32_1 = arith.constant 0 : i32
    return %arg0, %c0_i32, %c0_i32_0 : i32, i32, i32
  }
  func.func @transform_6(%arg0: i32) -> (i32, i32, i32) {
    %c0_i32 = arith.constant 0 : i32
    %c0_i32_0 = arith.constant 0 : i32
    %c0_i32_1 = arith.constant 0 : i32
    return %arg0, %c0_i32, %c0_i32_0 : i32, i32, i32
  }
  func.func @transform_7(%arg0: i32) -> (i32, i32, i32) {
    %c0_i32 = arith.constant 0 : i32
    %c0_i32_0 = arith.constant 0 : i32
    %c0_i32_1 = arith.constant 0 : i32
    return %arg0, %c0_i32, %c0_i32_0 : i32, i32, i32
  }
  func.func @transform_8(%arg0: i32) -> (i32, i32) {
    %c0_i32 = arith.constant 0 : i32
    %c0_i32_0 = arith.constant 0 : i32
    %c0_i32_1 = arith.constant 0 : i32
    return %c0_i32, %c0_i32_0 : i32, i32
  }
  func.func @transform_9(%arg0: i32) -> (i32, i32) {
    %c0_i32 = arith.constant 0 : i32
    %c0_i32_0 = arith.constant 0 : i32
    %c0_i32_1 = arith.constant 0 : i32
    return %c0_i32, %c0_i32_0 : i32, i32
  }
  func.func @transform_10(%arg0: i32) -> (i32, i32, i32) {
    %c0_i32 = arith.constant 0 : i32
    %c0_i32_0 = arith.constant 0 : i32
    %c0_i32_1 = arith.constant 0 : i32
    return %arg0, %c0_i32, %c0_i32_0 : i32, i32, i32
  }
}

</mosaic_0001>

<bundles_post_ra>
// kernel: gnngi_forward.1
= control target key start
LH: loop header
LB: loop body
LE: loop exit
PB: predicated region body
PF: predicated region fallthrough
CT: control target
= control target key end

     0   :  { %s2336_s13 = smov 0   ;;  %s2638_s0 = inlined_call_operand.vmem [shape: f32[2,8,12], index: 0, kind: input, shape index: {}]   ;;  %s2639_s1 = inlined_call_operand.vmem [shape: bf16[2,16,3], index: 1, kind: input, shape index: {}]   ;;  %s2640_s2 = inlined_call_operand.vmem [shape: bf16[2,16,8], index: 2, kind: input, shape index: {}]   ;;  %s2641_s3 = inlined_call_operand.vmem [shape: bf16[2,16,8], index: 3, kind: input, shape index: {}]   ;;  %s2642_s4 = inlined_call_operand.vmem [shape: bf16[2,8,16], index: 4, kind: input, shape index: {}]   ;;  %s2643_s5 = inlined_call_operand.vmem [shape: bf16[2,1,8], index: 5, kind: input, shape index: {}]   ;;  %s2644_s6 = inlined_call_operand.vmem [shape: f32[2,8,1], index: 6, kind: input, shape index: {}]   ;;  %s2645_s7 = inlined_call_operand.vmem [shape: f32[2,1,1], index: 7, kind: input, shape index: {}]   ;;  %s2646_s8 = inlined_call_operand.vmem [shape: bf16[304,16], index: 8, kind: input, shape index: {}]   ;;  %s2647_s9 = inlined_call_operand.vmem [shape: f32[56,16], index: 9, kind: input, shape index: {}]   ;;  %s2648_s10 = inlined_call_operand.vmem [shape: f32[2,8,2], index: 10, kind: output, shape index: {}]  }
   0x1 LB: > { %s1958_s14 = sadd.s32 4294967295, %s2275_s13   ;;  %p1962_p0 = scmp.ge.s32.totalorder %s2275_s13, 1  ;;  %s2275_s13 = sphi %s2336_s13, %s20_s13  }
   0x2   : > { %p375_p1 = scmp.lt.s32.totalorder %s2275_s13, 3 }
   0x4   : > { %p376_p2 = pnand %p1962_p0, %p375_p1 }
   0x5   : > { %p440_p3 = scmp.lt.s32.totalorder (!%p376_p2), %s1958_s14, 1  ;;  %v2277_v0 = vmov (!%p376_p2), 0.0   ;;  %vm2278_vm0 = vmmov (!%p376_p2), 0   ;;  %v2279_v1 = vmov (!%p376_p2), 0   ;;  %vm494_vm1 = vcmask (!%p376_p2), 1043456  }
   0x6   : > { %379 = sbr.rel (%p376_p2) target bundleno = 2712 (0xa98), region = 60  ;;  %2074 = vmatprep.subr.bf16.mxu0 (!%p376_p2), %v2277_v0  ;;  %2076 = vmatprep.mubr.msk.bf16.mxu0 (!%p376_p2), %vm2278_vm0, %v2277_v0  ;;  %vm490_vm2 = vcmask (!%p376_p2), 64512   ;;  %v2247_v8 = vld [vmem:[%s2646_s8 + $0x30] sm:$0x3f] (!%p376_p2)   ;;  %vm578_vm3 = vcmask (!%p376_p2), 1045504   ;;  %vm574_vm4 = vcmask (!%p376_p2), 97280   ;;  %v543_v12 = vlaneseq (!%p376_p2) }
   0x7   : > { %2246 = vset.pattern.permute.xlu0 (!%p376_p2), %v2279_v1  ;;  %2080 = vmatprep.subr.bf16.mxu1 (!%p376_p2), %v2277_v0  ;;  %v580_v9 = vsel (!%p376_p2), %vm578_vm3, %v2247_v8, 0  ;;  %v2248_v10 = vld [vmem:[%s2646_s8 + $0x18] sm:$0x3f] (!%p376_p2)   ;;  %v2249_v17 = vld [vmem:[%s2646_s8 + $0x20] sm:$0x3f] (!%p376_p2)   ;;  %vm839_vm5 = vcmask (!%p376_p2), 1040384  }
   0x8   : > { %2082 = vmatprep.mubr.msk.bf16.mxu1 (!%p376_p2), %vm2278_vm0, %v2277_v0  ;;  %2081 = vmatpush3.bf16.msra.mxu1 (!%p376_p2), %v580_v9  ;;  %v634_v11 = vsel (!%p376_p2), %vm578_vm3, %v2248_v10, 0  ;;  %v544_v13 = vshrl.u32 (!%p376_p2), %v543_v12, 7  ;;  %v682_v24 = vsel (!%p376_p2), %vm578_vm3, %v2249_v17, 0  ;;  %vm840_vm6 = vcmask (!%p376_p2), 1041408   ;;  %v558_v43 = vld [vmem:[%s2646_s8 + $0x28] sm:$0x3] (!%p376_p2) }
   0x9   : > { %2092 = vmatprep.subr.bf16.mxu1 (!%p376_p2), %v2277_v0  ;;  %v2280_v36 = vmov (!%p376_p2), 65535   ;;  %v2253_v50 = vld [vmem:[%s2646_s8 + $0x10] sm:$0x3f] (!%p376_p2)   ;;  %vm835_vm7 = vcmask (!%p376_p2), 23552   ;;  %vm896_vm8 = vcmask (!%p376_p2), 130048   ;;  %vm1270_vm9 = vcmask (!%p376_p2), 1044480  }
   0xa   : > { %v2397_v14 = vsub.s32 (!%p376_p2), 0, %v544_v13  ;;  %v841_v37 = vsel (!%p376_p2), %vm839_vm5, 4294967295, %v2280_v36  ;;  %v952_v52 = vsel (!%p376_p2), %vm578_vm3, %v2253_v50, 0  ;;  %vm1266_vm10 = vcmask (!%p376_p2), 80896  }
   0xb   : > { %v2437_v44 = vsel (!%p376_p2), %vm840_vm6, %v841_v37, 0  ;;  %vm1825_vm13 = vcmask (!%p376_p2), 15360  }
   0xc   : > { %v844_v49 = vand.u32 (!%p376_p2), %v2437_v44, %v558_v43 }
   0xd   : > { %s2650_s14 = smov (!%p440_p3, %s1958_s14), 1 }
   0xe   : > { %s2353_s15 = sshll.u32 %s2650_s14, 3  ;;  %s465_s18 = scalar_lea.vmem %s2643_s5, %s2650_s14 }
   0xf   : > { %s443_s21 = scalar_lea.vmem %s2638_s0, %s2353_s15  ;;  %s472_s24 = scalar_lea.vmem %s2645_s7, %s2650_s14  ;;  %v2373_v6 = vld [vmem:[%s465_s18] sm:$0x1] }
  0x10   : > { %v478_v2 = vld [vmem:[%s443_s21] sm:$0xff]  ;;  %s469_s27 = scalar_lea.vmem %s2644_s6, %s2353_s15  ;;  %s458_s19 = scalar_lea.vmem %s2641_s3, %s2353_s15 }
  0x11   : > { %v488_v3 = vld [vmem:[%s472_s24] sm:$0x1]  ;;  %v2371_v4 = vpack.c.bf16 %v478_v2, %v478_v2  ;;  %s453_s22 = scalar_lea.vmem %s2640_s2, %s2353_s15  ;;  %s448_s25 = scalar_lea.vmem %s2639_s1, %s2353_s15 }
  0x12   : > { %540 = vperm.xlu0 %2246, %v488_v3   ;;  %v487_v5 = vld [vmem:[%s469_s27] sm:$0xff]  ;;  %v1986_v3 = vld [vmem:[%s2647_s9 + $0x8] ss:$0 sm:$0xff]  ;;  %s1970_s17 = sshll.u32 %s2650_s14, 2  ;;  %s476_s21 = scalar_lea.vmem %s2648_s10, %s2353_s15 }
  0x13   : > { %v496_v7 = vsel %vm494_vm1, %v2371_v4, 0  ;;  %v2432_v39 = vld [vmem:[%s453_s22] sm:$0xff]   ;;  %s462_s20 = scalar_lea.vmem %s2642_s4, %s1970_s17 }
  0x14   : > { %2075 = vmatpush3.bf16.msra.mxu0 %v496_v7  ;;  %v2441_v48 = vld [vmem:[%s458_s19] sm:$0xff]  }
  0x15   : > { %2086 = vmatprep.subr.bf16.mxu0 %v2277_v0  ;;  %v2462_v51 = vld [vmem:[%s448_s25] sm:$0xff]  }
  0x16   : > { %942 = vperm.xlu0 %2246, %v487_v5  }
  0x17   : > { %2077 = vmatmul.mubr.msk.bf16.vlgmr.msra.gmra.mrb[0].mxu0 %vm490_vm2, %v2373_v6 }
  0x18   : > { %2088 = vmatprep.mubr.msk.bf16.mxu0 %vm2278_vm0, %v2277_v0  ;;  %2087 = vmatpush3.bf16.msra.mxu0 %v634_v11  ;;  %v2254_v11 = vld [vmem:[%s2646_s8] sm:$0x3f]  }
  0x19   : > { %2098 = vmatprep.subr.bf16.mxu0 %v2277_v0 }
  0x1f   : > { %2089 = vmatmul.mubr.msk.bf16.vlgmr.msra.gmra.mrb[4].mxu0 %vm574_vm4, %v2371_v4 }
  0x20   : > { %2100 = vmatprep.mubr.msk.bf16.mxu0 %vm2278_vm0, %v2277_v0 }
  0x91   : > { %v541_v15 = vpop.permute.xlu0 %540 }
  0x92   : > { %v2400_v16 = vrot.slane %v541_v15, %v2397_v14 }
  0xea   : > { %v532_v18 = vpop.f32.mrb[0].mxu0 }
  0xeb   : > { %v547_v19 = vmul.f32 %v2400_v16, %v532_v18  ;;  %v2078_v20 = vpop.f32.mrb[1].mxu0  ;;  %v2484_v18 = vld [vmem:[%s462_s20] sm:$0xf] }
  0xec   : > { %v535_v21 = vpop.f32.mrb[2].mxu0  ;;  %v1005_v20 = vsel %vm578_vm3, %v2254_v11, 0 }
  0xed   : > { %v2406_v22 = vpack.c.bf16 %v547_v19, %v547_v19  ;;  %v2079_v23 = vpop.f32.mrb[3].mxu0 }
  0xee   : > { %v2255_v23 = vld [vmem:[%s2646_s8 + $0x8] sm:$0xff]  }
  0xef   : > { %2083 = vmatmul.mubr.msk.bf16.vlgmr.msra.gmra.mrb[0].mxu1 %vm574_vm4, %v2406_v22 }
  0xf0   : > { %2093 = vmatpush3.bf16.msra.mxu1 %v682_v24  ;;  %2094 = vmatprep.mubr.msk.bf16.mxu1 %vm2278_vm0, %v2277_v0  ;;  %v2256_v24 = vld [vmem:[%s2646_s8 + $0x38] sm:$0x3f]  }
  0xf1   : > { %2104 = vmatprep.subr.bf16.mxu1 %v2277_v0 }
  0xf2   : > { %v670_v25 = vpop.f32.mrb[4].mxu0 }
  0xf3   : > { %v2090_v26 = vpop.f32.mrb[5].mxu0 }
  0xf4   : > { %v673_v27 = vpop.f32.mrb[6].mxu0 }
  0xf5   : > { %v2091_v28 = vpop.f32.mrb[7].mxu0 }
  0xf7   : > { %2095 = vmatmul.mubr.msk.bf16.vlgmr.msra.gmra.mrb[4].mxu1 %vm574_vm4, %v2371_v4 }
  0xf8   : > { %2106 = vmatprep.mubr.msk.bf16.mxu1 %vm2278_vm0, %v2277_v0 }
 0x1c2   : > { %v616_v29 = vpop.f32.mrb[0].mxu1 }
 0x1c3   : > { %v625_v30 = vrot.slane %v616_v29, %v2397_v14  ;;  %v2084_v31 = vpop.f32.mrb[1].mxu1 }
 0x1c4   : > { %v619_v32 = vpop.f32.mrb[2].mxu1 }
 0x1c5   : > { %v671_v33 = vadd.f32 %v670_v25, %v625_v30  ;;  %v2085_v34 = vpop.f32.mrb[3].mxu1  ;;  %v2504_v25 = vpop.permute.xlu0 %942  ;;  %v2257_v32 = vld [vmem:[%s2646_s8 + $0x60] sm:$0xff]  }
 0x1c7   : > { %v724_v35 = vpack.c.bf16 %v671_v33, %v671_v33  ;;  %v565_v33 = vld [vmem:[%s2647_s9] sm:$0x1] }
 0x1c9   : > { %v787_v38 = vsel %vm494_vm1, %v724_v35, 0 }
 0x1ca   : > { %v718_v40 = vpop.f32.mrb[4].mxu1  ;;  %2105 = vmatpush3.bf16.msra.mxu1 %v787_v38 }
 0x1cb   : > { %v725_v41 = vpack.c.bf16 %v718_v40, %v718_v40  ;;  %v2096_v42 = vpop.f32.mrb[5].mxu1  ;;  %2116 = vmatprep.subr.bf16.mxu1 %v2277_v0 }
 0x1cc   : > { %v721_v45 = vpop.f32.mrb[6].mxu1 }
 0x1cd   : > { %v735_v46 = vsel %vm494_vm1, %v725_v41, 0  ;;  %v2097_v47 = vpop.f32.mrb[7].mxu1  ;;  %2107 = vmatmul.mubr.msk.bf16.vlgmr.msra.gmra.mrb[8].mxu1 %vm490_vm2, %v2432_v39 }
 0x1ce   : > { %2099 = vmatpush3.bf16.msra.mxu0 %v735_v46  ;;  %2118 = vmatprep.mubr.msk.bf16.mxu1 %vm2278_vm0, %v2277_v0 }
 0x1cf   : > { %2110 = vmatprep.subr.bf16.mxu0 %v2277_v0 }
 0x1d1   : > { %2101 = vmatmul.mubr.msk.bf16.vlgmr.msra.gmra.mrb[8].mxu0 %vm490_vm2, %v2441_v48 }
 0x1d2   : > { %2111 = vmatpush3.bf16.msra.mxu0 %v844_v49  ;;  %2112 = vmatprep.mubr.msk.bf16.mxu0 %vm2278_vm0, %v2277_v0 }
 0x1d3   : > { %2122 = vmatprep.subr.bf16.mxu0 %v2277_v0 }
 0x1d9   : > { %2113 = vmatmul.mubr.msk.bf16.vlgmr.msra.gmra.mrb[12].mxu0 %vm835_vm7, %v2462_v51 }
 0x1da   : > { %2123 = vmatpush3.bf16.msra.mxu0 %v952_v52  ;;  %2124 = vmatprep.mubr.msk.bf16.mxu0 %vm2278_vm0, %v2277_v0  ;;  %v2258_v52 = vld [vmem:[%s2646_s8 + $0x40] sm:$0xff]  }
 0x1db   : > { %2140 = vmatprep.subr.bf16.mxu0 %v2277_v0 }
 0x1e1   : > { %2125 = vmatmul.mubr.msk.bf16.vlgmr.msra.gmra.mrb[16].mxu0 %vm574_vm4, %v2406_v22 }
 0x1e2   : > { %2142 = vmatprep.mubr.msk.bf16.mxu0 %vm2278_vm0, %v2277_v0 }
 0x2a0   : > { %v823_v53 = vpop.f32.mrb[8].mxu1 }
 0x2a1   : > { %v2108_v54 = vpop.f32.mrb[9].mxu1 }
 0x2a2   : > { %v826_v55 = vpop.f32.mrb[10].mxu1 }
 0x2a3   : > { %v2109_v56 = vpop.f32.mrb[11].mxu1 }
 0x2a4   : > { %v771_v57 = vpop.f32.mrb[8].mxu0 }
 0x2a5   : > { %v824_v58 = vadd.f32 %v823_v53, %v771_v57  ;;  %v2102_v59 = vpop.f32.mrb[9].mxu0 }
 0x2a6   : > { %v774_v60 = vpop.f32.mrb[10].mxu0 }
 0x2a7   : > { %v827_v61 = vadd.f32 %v826_v55, %v774_v60  ;;  %v2103_v62 = vpop.f32.mrb[11].mxu0 }
 0x2a8   : > { %v2259_v62 = vld [vmem:[%s2646_s8 + $0x78] sm:$0x1f]  }
 0x2ac   : > { %v880_v63 = vpop.f32.mrb[12].mxu0 }
 0x2ad   : > { %v887_v1 = vadd.f32 %v880_v63, %v824_v58  ;;  %v2114_v2 = vpop.f32.mrb[13].mxu0  ;;  %v1272_v63 = vsel %vm1270_vm9, %v2259_v62, 0 }
 0x2ae   : > { %v883_v5 = vpop.f32.mrb[14].mxu0 }
 0x2af   : > { %v888_v7 = vadd.f32 %v883_v5, %v827_v61  ;;  %v2115_v8 = vpop.f32.mrb[15].mxu0  ;;  %v893_v9 = vadd.f32 %v1986_v3, %v887_v1 }
 0x2b1   : > { %v894_v10 = vadd.f32 %v1986_v3, %v888_v7 }
 0x2b3   : > { %v895_v13 = vpack.c.bf16 %v894_v10, %v893_v9  ;;  %v2260_v10 = vld [vmem:[%s2646_s8 + $0x68] sm:$0xff]  }
 0x2b4   : > { %v988_v15 = vpop.f32.mrb[16].mxu0 }
 0x2b5   : > { %2117 = vmatpush3.bf16.msra.mxu1 %v895_v13  ;;  %v2126_v17 = vpop.f32.mrb[17].mxu0  ;;  %v994_v34 = vadd.f32 %v988_v15, %v565_v33 }
 0x2b6   : > { %v991_v19 = vpop.f32.mrb[18].mxu0  ;;  %2128 = vmatprep.subr.bf16.mxu1 %v2277_v0 }
 0x2b7   : > { %v2127_v21 = vpop.f32.mrb[19].mxu0  ;;  %v998_v35 = vrot.slane %v994_v34, %v2397_v14 }
 0x2b8   : > { %2119 = vmatmul.mubr.msk.bf16.vlgmr.msra.gmra.mrb[12].mxu1 %vm896_vm8, %v2484_v18 }
 0x2b9   : > { %2129 = vmatpush3.bf16.msra.mxu1 %v1005_v20  ;;  %2130 = vmatprep.mubr.msk.bf16.mxu1 %vm2278_vm0, %v2277_v0 }
 0x2ba   : > { %2134 = vmatprep.subr.bf16.mxu1 %v2277_v0 }
 0x2c0   : > { %2131 = vmatmul.mubr.msk.bf16.vlgmr.msra.gmra.mrb[16].mxu1 %vm574_vm4, %v2371_v4  ;;  %v1199_v4 = vsel %vm578_vm3, %v2256_v24, 0 }
 0x2c1   : > { %2135 = vmatpush3.bf16.msra.mxu1 %v2255_v23  ;;  %2136 = vmatprep.mubr.msk.bf16.mxu1 %vm2278_vm0, %v2277_v0 }
 0x2c2   : > { %2152 = vmatprep.subr.bf16.mxu1 %v2277_v0 }
 0x38b   : > { %v934_v26 = vpop.f32.mrb[12].mxu1 }
 0x38c   : > { %v945_v27 = vmul.f32 %v2504_v25, %v934_v26  ;;  %v2120_v28 = vpop.f32.mrb[13].mxu1 }
 0x38d   : > { %v937_v29 = vpop.f32.mrb[14].mxu1 }
 0x38e   : > { %v1047_v30 = vpack.c.bf16 %v945_v27, %v945_v27  ;;  %v2121_v31 = vpop.f32.mrb[15].mxu1  ;;  %v1254_v29 = vld [vmem:[%s2646_s8 + $0x70] sm:$0x3] }
 0x390   : > { %2137 = vmatmul.mubr.msk.bf16.vlgmr.msra.gmra.mrb[16].mxu1 %vm896_vm8, %v1047_v30 }
 0x391   : > { %2153 = vmatpush3.bf16.msra.mxu1 %v1199_v4  ;;  %2154 = vmatprep.mubr.msk.bf16.mxu1 %vm2278_vm0, %v2277_v0 }
 0x392   : > { %2164 = vmatprep.subr.bf16.mxu1 %v2277_v0 }
 0x398   : > { %2155 = vmatmul.mubr.msk.bf16.vlgmr.msra.gmra.mrb[20].mxu1 %vm574_vm4, %v2406_v22 }
 0x399   : > { %2166 = vmatprep.mubr.msk.bf16.mxu1 %vm2278_vm0, %v2277_v0  ;;  %2165 = vmatpush3.bf16.msra.mxu1 %v2257_v32  ;;  %v1504_v32 = vand.u32 %v1254_v29, %v2437_v44 }
 0x39a   : > { %2176 = vmatprep.subr.bf16.mxu1 %v2277_v0 }
 0x463   : > { %v1091_v36 = vpop.f32.mrb[16].mxu1 }
 0x464   : > { %v2224_v37 = vadd.f32 %v1091_v36, %v998_v35  ;;  %v2138_v22 = vpop.f32.mrb[17].mxu1 }
 0x465   : > { %v1094_v38 = vpop.f32.mrb[18].mxu1 }
 0x466   : > { %v1098_v40 = vpack.c.bf16 %v2224_v37, %v2224_v37  ;;  %v2524_v41 = vmax.f32 %v2224_v37, 0.0  ;;  %v2139_v42 = vpop.f32.mrb[19].mxu1 }
 0x468   : > { %v2528_v43 = vpack.c.bf16 %v2524_v41, %v2524_v41  ;;  %v1100_v45 = vsel %vm494_vm1, %v1098_v40, 0 }
 0x469   : > { %2141 = vmatpush3.bf16.msra.mxu0 %v1100_v45 }
 0x46a   : > { %2167 = vmatmul.mubr.msk.bf16.vlgmr.msra.gmra.mrb[24].mxu1 %vm896_vm8, %v2528_v43  ;;  %2146 = vmatprep.subr.bf16.mxu0 %v2277_v0 }
 0x46b   : > { %v1235_v46 = vpop.f32.mrb[20].mxu1  ;;  %2178 = vmatprep.mubr.msk.bf16.mxu1 %vm2278_vm0, %v2277_v0 }
 0x46c   : > { %2143 = vmatmul.mubr.msk.bf16.vlgmr.msra.gmra.mrb[20].mxu0 %vm490_vm2, %v2373_v6  ;;  %v2156_v47 = vpop.f32.mrb[21].mxu1 }
 0x46d   : > { %v1238_v49 = vpop.f32.mrb[22].mxu1  ;;  %2148 = vmatprep.mubr.msk.bf16.mxu0 %vm2278_vm0, %v2277_v0  ;;  %2147 = vmatpush3.bf16.msra.mxu0 %v2258_v52  ;;  %v2008_v47 = vld [vmem:[%s2647_s9 + $0x20] ss:$0 sm:$0xff] }
 0x46e   : > { %v2157_v50 = vpop.f32.mrb[23].mxu1  ;;  %2158 = vmatprep.subr.bf16.mxu0 %v2277_v0 }
 0x53d   : > { %v1361_v53 = vpop.f32.mrb[24].mxu1 }
 0x53e   : > { %v2168_v54 = vpop.f32.mrb[25].mxu1 }
 0x53f   : > { %v1136_v55 = vpop.f32.mrb[20].mxu0  ;;  %v1364_v56 = vpop.f32.mrb[26].mxu1 }
 0x540   : > { %v1142_v57 = vmul.f32 %v1136_v55, %v2400_v16  ;;  %v2144_v6 = vpop.f32.mrb[21].mxu0  ;;  %v2169_v58 = vpop.f32.mrb[27].mxu1  ;;  %v567_v16 = vld [vmem:[%s2647_s9 + $0x10] sm:$0x1] }
 0x541   : > { %v1139_v59 = vpop.f32.mrb[22].mxu0  ;;  %v2262_v6 = vld [vmem:[%s2646_s8 + $0x48] sm:$0xff]  }
 0x542   : > { %v1143_v60 = vpack.c.bf16 %v1142_v57, %v1142_v57  ;;  %v2145_v61 = vpop.f32.mrb[23].mxu0 }
 0x544   : > { %2149 = vmatmul.mubr.msk.bf16.vlgmr.msra.gmra.mrb[24].mxu0 %vm896_vm8, %v1143_v60  ;;  %v2263_v60 = vld [vmem:[%s2646_s8 + $0x50] sm:$0xff]  }
 0x545   : > { %2160 = vmatprep.mubr.msk.bf16.mxu0 %vm2278_vm0, %v2277_v0  ;;  %2159 = vmatpush3.bf16.msra.mxu0 %v1272_v63 }
 0x546   : > { %2170 = vmatprep.subr.bf16.mxu0 %v2277_v0 }
 0x617   : > { %v1187_v1 = vpop.f32.mrb[24].mxu0 }
 0x618   : > { %v1236_v2 = vadd.f32 %v1235_v46, %v1187_v1  ;;  %v2150_v3 = vpop.f32.mrb[25].mxu0 }
 0x619   : > { %v1190_v5 = vpop.f32.mrb[26].mxu0 }
 0x61a   : > { %v1241_v7 = vadd.f32 %v1236_v2, %v567_v16  ;;  %v2151_v8 = vpop.f32.mrb[27].mxu0  ;;  %v2264_v2 = vld [vmem:[%s2646_s8 + $0x90] sm:$0xff]  }
 0x61c   : > { %v1243_v9 = vmax.f32 %v1241_v7, 0.0 }
 0x61e   : > { %v1260_v11 = vpack.c.bf16 %v1243_v9, %v1243_v9 }
 0x620   : > { %2161 = vmatmul.mubr.msk.bf16.vlgmr.msra.gmra.mrb[28].mxu0 %vm1266_vm10, %v1260_v11 }
 0x621   : > { %2171 = vmatpush3.bf16.msra.mxu0 %v2260_v10  ;;  %2172 = vmatprep.mubr.msk.bf16.mxu0 %vm2278_vm0, %v2277_v0 }
 0x622   : > { %2182 = vmatprep.subr.bf16.mxu0 %v2277_v0 }
 0x628   : > { %2173 = vmatmul.mubr.msk.bf16.vlgmr.msra.gmra.mrb[32].mxu0 %vm896_vm8, %v2528_v43 }
 0x629   : > { %2184 = vmatprep.mubr.msk.bf16.mxu0 %vm2278_vm0, %v2277_v0 }
 0x6f3   : > { %v1308_v13 = vpop.f32.mrb[28].mxu0 }
 0x6f4   : > { %v1317_v15 = vrot.slane %v1308_v13, %v2397_v14  ;;  %v2162_v17 = vpop.f32.mrb[29].mxu0 }
 0x6f5   : > { %v1311_v19 = vpop.f32.mrb[30].mxu0 }
 0x6f6   : > { %v1362_v20 = vadd.f32 %v1361_v53, %v1317_v15  ;;  %v2163_v21 = vpop.f32.mrb[31].mxu0  ;;  %v2016_v15 = vld [vmem:[%s2647_s9 + $0x30] ss:$0 sm:$0xff] }
 0x6f8   : > { %v1413_v23 = vpack.c.bf16 %v1362_v20, %v1362_v20 }
 0x6fa   : > { %v1460_v24 = vsel %vm494_vm1, %v1413_v23, 0 }
 0x6fb   : > { %v1407_v26 = vpop.f32.mrb[32].mxu0  ;;  %2183 = vmatpush3.bf16.msra.mxu0 %v1460_v24 }
 0x6fc   : > { %v1414_v27 = vpack.c.bf16 %v1407_v26, %v1407_v26  ;;  %v2174_v28 = vpop.f32.mrb[33].mxu0  ;;  %2194 = vmatprep.subr.bf16.mxu0 %v2277_v0 }
 0x6fd   : > { %v1410_v30 = vpop.f32.mrb[34].mxu0 }
 0x6fe   : > { %v1416_v31 = vsel %vm494_vm1, %v1414_v27, 0  ;;  %v2175_v4 = vpop.f32.mrb[35].mxu0  ;;  %2185 = vmatmul.mubr.msk.bf16.vlgmr.msra.gmra.mrb[36].mxu0 %vm490_vm2, %v2432_v39  ;;  %v2261_v39 = vld [vmem:[%s2646_s8 + $0x58] sm:$0x1f]  }
 0x6ff   : > { %2177 = vmatpush3.bf16.msra.mxu1 %v1416_v31  ;;  %2196 = vmatprep.mubr.msk.bf16.mxu0 %vm2278_vm0, %v2277_v0  ;;  %v1603_v44 = vsel %vm1270_vm9, %v2261_v39, 0  ;;  %v1807_v31 = vand.u32 127, %v543_v12 }
 0x700   : > { %2188 = vmatprep.subr.bf16.mxu1 %v2277_v0 }
 0x701   : > { %vm1823_vm12 = vcmp.eq.s32.totalorder %v1807_v31, 0 }
 0x702   : > { %2179 = vmatmul.mubr.msk.bf16.vlgmr.msra.gmra.mrb[28].mxu1 %vm490_vm2, %v2441_v48 }
 0x703   : > { %2189 = vmatpush3.bf16.msra.mxu1 %v1504_v32  ;;  %2190 = vmatprep.mubr.msk.bf16.mxu1 %vm2278_vm0, %v2277_v0 }
 0x704   : > { %2200 = vmatprep.subr.bf16.mxu1 %v2277_v0 }
 0x70a   : > { %2191 = vmatmul.mubr.msk.bf16.vlgmr.msra.gmra.mrb[32].mxu1 %vm835_vm7, %v2462_v51 }
 0x70b   : > { %2201 = vmatpush3.bf16.msra.mxu1 %v1603_v44  ;;  %2202 = vmatprep.mubr.msk.bf16.mxu1 %vm2278_vm0, %v2277_v0 }
 0x70c   : > { %2218 = vmatprep.subr.bf16.mxu1 %v2277_v0 }
 0x712   : > { %2203 = vmatmul.mubr.msk.bf16.vlgmr.msra.gmra.mrb[36].mxu1 %vm1266_vm10, %v1260_v11 }
 0x713   : > { %2220 = vmatprep.mubr.msk.bf16.mxu1 %vm2278_vm0, %v2277_v0  ;;  %2219 = vmatpush3.bf16.msra.mxu1 %v2264_v2 }
 0x7d1   : > { %v1496_v48 = vpop.f32.mrb[36].mxu0 }
 0x7d2   : > { %v2186_v33 = vpop.f32.mrb[37].mxu0 }
 0x7d3   : > { %v1499_v34 = vpop.f32.mrb[38].mxu0 }
 0x7d4   : > { %v2187_v35 = vpop.f32.mrb[39].mxu0 }
 0x7d5   : > { %v1452_v36 = vpop.f32.mrb[28].mxu1 }
 0x7d6   : > { %v1497_v37 = vadd.f32 %v1496_v48, %v1452_v36  ;;  %v2180_v22 = vpop.f32.mrb[29].mxu1 }
 0x7d7   : > { %v1455_v38 = vpop.f32.mrb[30].mxu1 }
 0x7d8   : > { %v1500_v51 = vadd.f32 %v1499_v34, %v1455_v38  ;;  %v2181_v40 = vpop.f32.mrb[31].mxu1 }
 0x7dd   : > { %v1540_v42 = vpop.f32.mrb[32].mxu1 }
 0x7de   : > { %v1547_v45 = vadd.f32 %v1540_v42, %v1497_v37  ;;  %v2192_v46 = vpop.f32.mrb[33].mxu1 }
 0x7df   : > { %v1543_v49 = vpop.f32.mrb[34].mxu1 }
 0x7e0   : > { %v1548_v50 = vadd.f32 %v1543_v49, %v1500_v51  ;;  %v2193_v52 = vpop.f32.mrb[35].mxu1  ;;  %v1553_v53 = vadd.f32 %v2008_v47, %v1547_v45 }
 0x7e2   : > { %v1554_v54 = vadd.f32 %v2008_v47, %v1548_v50 }
 0x7e4   : > { %v1555_v55 = vpack.c.bf16 %v1554_v54, %v1553_v53 }
 0x7e5   : > { %v1639_v56 = vpop.f32.mrb[36].mxu1 }
 0x7e6   : > { %2195 = vmatpush3.bf16.msra.mxu0 %v1555_v55  ;;  %v2204_v57 = vpop.f32.mrb[37].mxu1 }
 0x7e7   : > { %v1642_v58 = vpop.f32.mrb[38].mxu1  ;;  %2206 = vmatprep.subr.bf16.mxu0 %v2277_v0 }
 0x7e8   : > { %v2205_v59 = vpop.f32.mrb[39].mxu1 }
 0x7e9   : > { %2197 = vmatmul.mubr.msk.bf16.vlgmr.msra.gmra.mrb[40].mxu0 %vm896_vm8, %v2484_v18 }
 0x7ea   : > { %2207 = vmatpush3.bf16.msra.mxu0 %v2262_v6  ;;  %2208 = vmatprep.mubr.msk.bf16.mxu0 %vm2278_vm0, %v2277_v0 }
 0x7eb   : > { %2212 = vmatprep.subr.bf16.mxu0 %v2277_v0 }
 0x7f1   : > { %2209 = vmatmul.mubr.msk.bf16.vlgmr.msra.gmra.mrb[44].mxu0 %vm896_vm8, %v2528_v43  ;;  %v1257_v43 = vld [vmem:[%s2647_s9 + $0x18] sm:$0x1] }
 0x7f2   : > { %2213 = vmatpush3.bf16.msra.mxu0 %v2263_v60  ;;  %2214 = vmatprep.mubr.msk.bf16.mxu0 %vm2278_vm0, %v2277_v0  ;;  %v1645_v3 = vadd.f32 %v1639_v56, %v1257_v43 }
 0x7f4   : > { %v1649_v0 = vrot.slane %v1645_v3, %v2397_v14 }
 0x8bc   : > { %v1590_v61 = vpop.f32.mrb[40].mxu0 }
 0x8bd   : > { %v1596_v18 = vmul.f32 %v1590_v61, %v2504_v25  ;;  %v2198_v62 = vpop.f32.mrb[41].mxu0 }
 0x8be   : > { %v1593_v63 = vpop.f32.mrb[42].mxu0 }
 0x8bf   : > { %v1696_v16 = vpack.c.bf16 %v1596_v18, %v1596_v18  ;;  %v2199_v1 = vpop.f32.mrb[43].mxu0 }
 0x8c1   : > { %2215 = vmatmul.mubr.msk.bf16.vlgmr.msra.gmra.mrb[44].mxu0 %vm896_vm8, %v1696_v16 }
 0x994   : > { %v1740_v5 = vpop.f32.mrb[44].mxu0 }
 0x995   : > { %v2225_v25 = vadd.f32 %v1740_v5, %v1649_v0  ;;  %v2216_v7 = vpop.f32.mrb[45].mxu0 }
 0x996   : > { %v1743_v8 = vpop.f32.mrb[46].mxu0 }
 0x997   : > { %v1747_v9 = vmax.f32 %v2225_v25, 0.0  ;;  %v2217_v10 = vpop.f32.mrb[47].mxu0 }
 0x999   : > { %v1748_v11 = vadd.f32 %v1747_v9, %v2524_v41 }
 0x99b   : > { %v1752_v13 = vpack.c.bf16 %v1748_v11, %v1748_v11 }
 0x99d   : > { %2221 = vmatmul.mubr.msk.bf16.vlgmr.msra.gmra.mrb[40].mxu1 %vm896_vm8, %v1752_v13 }
 0xa70   : > { %v1800_v17 = vpop.f32.mrb[40].mxu1 }
 0xa71   : > { %v1801_v19 = vadd.f32 %v2016_v15, %v1800_v17  ;;  %v2222_v20 = vpop.f32.mrb[41].mxu1 }
 0xa72   : > { %v1803_v21 = vpop.f32.mrb[42].mxu1 }
 0xa73   : > { %v1809_v14 = vand.u32 2147483647, %v1801_v19  ;;  %v2223_v23 = vpop.f32.mrb[43].mxu1  ;;  %v1808_v44 = vmax.f32 %v1801_v19, 0.0 }
 0xa75   : > { %v1810_v24 = vsub.f32 0.0, %v1809_v14 }
 0xa77   : > { %v1811_v26 = vmul.f32 1.442695, %v1810_v24 }
 0xa79   : > { %2265 = vpow2.f32 %v1811_v26 }
 0xa83   : > { %v2266_v27 = vpop.eup %2265 }
 0xa84   : > { %v1813_v28 = vadd.f32 1.0, %v2266_v27  ;;  %v1816_v41 = vmul.f32 -0.5, %v2266_v27  ;;  %v1819_v30 = vand.u32 2147483647, %v2266_v27 }
 0xa86   : > { %2267 = vlog2.f32 %v1813_v28  ;;  %v1817_v29 = vadd.f32 1.0, %v1816_v41  ;;  %vm1820_vm11 = vcmp.lt.f32.partialorder %v1819_v30, 0.0004427343 }
 0xa88   : > { %v1818_v39 = vmul.f32 %v2266_v27, %v1817_v29 }
 0xa90   : > { %v2268_v4 = vpop.eup %2267 }
 0xa91   : > { %v1815_v32 = vmul.f32 0.6931472, %v2268_v4 }
 0xa93   : > { %v1821_v48 = vsel %vm1820_vm11, %v1818_v39, %v1815_v32 }
 0xa94   : > { %v1822_v33 = vadd.f32 %v1821_v48, %v1808_v44 }
 0xa96   : > { %v1824_v34 = vsel %vm1823_vm12, %v1801_v19, %v1822_v33 }
 0xa97   : > { %1826 = vst.msk [vmem:[%s476_s21] sm:$0xff] %vm1825_vm13, %v1824_v34 }
 0xa98 PF: > { %s20_s13 = sadd.s32 1, %s2275_s13  }
 0xa99   : > { %p17_p4 = scmp.ge.s32.totalorder %s20_s13, 4  }
 0xa9b   :  { %19 = sbr.rel (!%p17_p4) target bundleno = 1 (0x1), region = 111 }

</bundles_post_ra>
